<compile_context>
chip_gen: v6e
topology: v6e:2x2x1
jax: 0.10.0
libtpu: 0.0.40
codegen_flags: <defaults>
</compile_context>

<pallas_src>
import math
import functools

import jax
import jax.numpy as jnp
from jax.experimental import pallas as pl
from jax.experimental.pallas import tpu as pltpu


def _gaussian_param_kernel(logits_ref, out_ref, *, weight_cap):
    # logits_ref: (2, dim) f32 — row 0 = std_logit, row 1 = weight_logit.
    x = logits_ref[...]

    # Row 0 transform: std = softplus(x) + 1e-5  (overflow-safe form).
    softplus = jnp.maximum(x, 0.0) + jnp.log1p(jnp.exp(-jnp.abs(x)))
    std = softplus + 1e-5

    # Row 1 transform: weight = sigmoid(x) * weight_cap, stable sigmoid with a
    # single reciprocal (exp only of -|x|; both where-branches finite).
    e = jnp.exp(-jnp.abs(x))
    r = pl.reciprocal(1.0 + e)               # exact; approx=True would cost ~1e-3 abs after *weight_cap
    sig = jnp.where(x >= 0, r, e * r)
    weight = sig * weight_cap

    # Select per row (whole tile is a single vreg; computing both transforms on
    # both rows and selecting avoids any sublane slicing / layout copies).
    row = jax.lax.broadcasted_iota(jnp.int32, x.shape, 0)
    out_ref[...] = jnp.where(row == 0, std, weight)


def gaussian_param_forward(mean, std_logit, weight_logit, *, max_weight):
    """Pallas equivalent of _GaussianParamModule.forward().

    mean, std_logit, weight_logit: (1, dim) float32 parameters.
    Returns (mean, std, weight), each (1, dim) float32.
    """
    assert mean.ndim == 2 and mean.shape[0] == 1
    assert std_logit.shape == mean.shape and weight_logit.shape == mean.shape
    dim = mean.shape[-1]
    # TODO(synk): weight_cap is baked in as a compile-time constant; if
    # max_weight ever becomes a traced/learned value this must be passed as an
    # operand instead.
    weight_cap = float(max_weight) * math.sqrt(float(dim))

    # Pack the two logit rows into one (2, dim) operand: 1 DMA in, 1 DMA out.
    packed = jnp.concatenate(
        [std_logit.astype(jnp.float32), weight_logit.astype(jnp.float32)], axis=0)

    kernel = functools.partial(_gaussian_param_kernel, weight_cap=weight_cap)

    out = pl.pallas_call(
        kernel,
        out_shape=jax.ShapeDtypeStruct((2, dim), jnp.float32),
        in_specs=[pl.BlockSpec(memory_space=pltpu.MemorySpace.VMEM)],
        out_specs=pl.BlockSpec(memory_space=pltpu.MemorySpace.VMEM),
    )(packed)

    std = out[0:1, :]
    weight = out[1:2, :]
    # mean + 0.0 is an autograd nicety in PyTorch; values are identical, so
    # return the parameter directly instead of DMAing it through the kernel.
    return mean, std, weight


def _init_params(dim, max_weight, key):
    """Parameter construction mirroring the PyTorch __init__, plus a small
    random perturbation so both sign branches of the stable softplus/sigmoid
    formulas are exercised."""
    mean = jnp.linspace(0.0, 1.0, dim + 2, dtype=jnp.float32)[1:-1].reshape(1, dim)
    std_logit = jnp.full((1, dim), math.log(math.exp(2.0 / dim) - 1.0), jnp.float32)
    weight_logit = jnp.full((1, dim), -math.log(max_weight / 1.0 - 1.0), jnp.float32)

    k1, k2, k3 = jax.random.split(key, 3)
    mean = mean + 0.01 * jax.random.normal(k1, (1, dim), jnp.float32)
    std_logit = std_logit + 2.0 * jax.random.normal(k2, (1, dim), jnp.float32)
    weight_logit = weight_logit + 2.0 * jax.random.normal(k3, (1, dim), jnp.float32)
    return mean, std_logit, weight_logit


def _reference(mean, std_logit, weight_logit, *, max_weight):
    dim = mean.shape[-1]
    weight_cap = max_weight * math.sqrt(dim)
    std = jax.nn.softplus(std_logit) + 1e-5
    weight = jax.nn.sigmoid(weight_logit) * weight_cap
    return mean + 0.0, std, weight


if __name__ == "__main__":
    DIM = 32
    MAX_WEIGHT = 4.0

    key = jax.random.PRNGKey(0)
    mean, std_logit, weight_logit = _init_params(DIM, MAX_WEIGHT, key)

    out_mean, out_std, out_w = gaussian_param_forward(
        mean, std_logit, weight_logit, max_weight=MAX_WEIGHT)
    out_mean, out_std, out_w = jax.block_until_ready((out_mean, out_std, out_w))

    ref_mean, ref_std, ref_w = _reference(
        mean, std_logit, weight_logit, max_weight=MAX_WEIGHT)

    assert out_mean.shape == (1, DIM) and out_mean.dtype == jnp.float32
    assert out_std.shape == (1, DIM) and out_std.dtype == jnp.float32
    assert out_w.shape == (1, DIM) and out_w.dtype == jnp.float32
    assert jnp.max(jnp.abs(out_mean - ref_mean)) < 1e-6
    assert jnp.max(jnp.abs(out_std - ref_std)) < 1e-5
    assert jnp.max(jnp.abs(out_w - ref_w)) < 1e-4

    # TODO(synk): the module's train()/_detach_out flag only toggles gradient
    # detachment; it has no effect on forward values and is not representable
    # in a forward-only Pallas kernel.

    print("KERNEL_OK")
</pallas_src>

<mosaic_0001>
module attributes {stable_mosaic.version = 11 : i64} {
  func.func @_gaussian_param_kernel(%arg0: memref<2x32xf32, #tpu.memory_space<vmem>>, %arg1: memref<2x32xf32, #tpu.memory_space<vmem>>) attributes {dimension_semantics = [], scalar_prefetch = 0 : i64, scratch_operands = 0 : i64, tpu.core_type = #tpu.core_type<tc>} {
    %c0 = arith.constant 0 : index
    %c0_0 = arith.constant 0 : index
    %0 = vector.load %arg0[%c0, %c0_0] : memref<2x32xf32, #tpu.memory_space<vmem>>, vector<2x32xf32>
    %cst = arith.constant 0.000000e+00 : f32
    %1 = vector.broadcast %cst : f32 to vector<2x32xf32>
    %2 = arith.maximumf %0, %1 : vector<2x32xf32>
    %3 = math.absf %0 : vector<2x32xf32>
    %cst_1 = arith.constant 0.000000e+00 : f32
    %4 = vector.broadcast %cst_1 : f32 to vector<2x32xf32>
    %5 = arith.subf %4, %3 : vector<2x32xf32>
    %6 = math.exp %5 : vector<2x32xf32>
    %7 = math.log1p %6 : vector<2x32xf32>
    %8 = arith.addf %2, %7 : vector<2x32xf32>
    %cst_2 = arith.constant 9.99999974E-6 : f32
    %9 = vector.broadcast %cst_2 : f32 to vector<2x32xf32>
    %10 = arith.addf %8, %9 : vector<2x32xf32>
    %11 = math.absf %0 : vector<2x32xf32>
    %cst_3 = arith.constant 0.000000e+00 : f32
    %12 = vector.broadcast %cst_3 : f32 to vector<2x32xf32>
    %13 = arith.subf %12, %11 : vector<2x32xf32>
    %14 = math.exp %13 : vector<2x32xf32>
    %cst_4 = arith.constant 1.000000e+00 : f32
    %15 = vector.broadcast %cst_4 : f32 to vector<2x32xf32>
    %16 = arith.addf %15, %14 : vector<2x32xf32>
    %17 = tpu.reciprocal %16 : vector<2x32xf32> -> vector<2x32xf32>
    %cst_5 = arith.constant 0.000000e+00 : f32
    %18 = vector.broadcast %cst_5 : f32 to vector<2x32xf32>
    %19 = arith.cmpf oge, %0, %18 : vector<2x32xf32>
    %20 = arith.mulf %14, %17 : vector<2x32xf32>
    %21 = arith.select %19, %17, %20 : vector<2x32xi1>, vector<2x32xf32>
    %cst_6 = arith.constant 22.6274166 : f32
    %22 = vector.broadcast %cst_6 : f32 to vector<2x32xf32>
    %23 = arith.mulf %21, %22 : vector<2x32xf32>
    %24 = tpu.iota {dimensions = array<i32: 0>} : vector<2x32xi32>
    %c0_i32 = arith.constant 0 : i32
    %25 = vector.broadcast %c0_i32 : i32 to vector<2x32xi32>
    %26 = arith.cmpi eq, %24, %25 : vector<2x32xi32>
    %27 = arith.select %26, %10, %23 : vector<2x32xi1>, vector<2x32xf32>
    %c0_7 = arith.constant 0 : index
    %c0_8 = arith.constant 0 : index
    %28 = vector.load %arg1[%c0_7, %c0_8] : memref<2x32xf32, #tpu.memory_space<vmem>>, vector<2x32xf32>
    tpu.vector_store %arg1[%c0_7, %c0_8], %27 {strides = array<i32>} : memref<2x32xf32, #tpu.memory_space<vmem>>, vector<2x32xf32>,
    return
  }
}

</mosaic_0001>

<bundles_post_ra>
// kernel: tpu_custom_call.1
= control target key start
LH: loop header
LB: loop body
LE: loop exit
PB: predicated region body
PF: predicated region fallthrough
CT: control target
= control target key end

     0   :  { %6 = vsyncpa [#allocation3], 0  ;;  %s135_s0 = inlined_call_operand.hbm [shape: f32[2,32], index: 0, kind: input, shape index: {}]   ;;  %s136_s1 = inlined_call_operand.hbm [shape: f32[2,32], index: 1, kind: output, shape index: {}]  }
   0x1   :  { %7 = vsyncpa [#allocation4], 0  ;;  %s117_s6 = smov [#allocation2]  }
   0x2   :  { %s14_s7 = sshll.u32 %s117_s6, 4  ;;  %s15_s7 = int_to_ptr.vmem [resolvable:$true] %s14_s7 }
   0x3   :  { %s81_s8 = scalar_lea.vmem %s15_s7, 32  ;;  %p86_p1 = scmp.lt.s32.totalorder %s15_s7, %s15_s7 }
   0x4   :  { %p82_p0 = scmp.ne.s32.totalorder %s15_s7, %s81_s8  ;;  %p87_p2 = scmp.lt.s32.totalorder %s81_s8, %s81_s8 }
   0x6   :  { %p88_p3 = por %p87_p2, %p86_p1 }
   0x8   :  { %p89_p4 = pnand %p88_p3, %p82_p0 }
   0xa   :  { %92 = shalt.err (!%p89_p4)
}
   0xb   :  { %17 = dma.hbm_to_vmem [thread:$0]  %s135_s0, 32, %s15_s7, [#allocation3]  }
   0xc   :  { %113 = dma.done.wait [#allocation3], 32  }
   0xd   :  { %114 = vsyncadd [#allocation3], 4294967264  ;;  %v21_v0 = vld [vmem:[#allocation2] sm:$0x3]  ;;  %v44_v9 = vlaneseq  ;;  %s118_s0 = smov [#allocation5]   ;;  %vm48_vm3 = vcmask 254976  }
   0xe   :  { %v23_v1 = vand.u32 2147483647, %v21_v0  ;;  %v22_v12 = vmax.f32 %v21_v0, 0.0  ;;  %vm40_vm1 = vcmp.ge.f32.partialorder %v21_v0, 0.0  ;;  %s56_s11 = sshll.u32 %s118_s0, 4  ;;  %s57_s11 = int_to_ptr.vmem [resolvable:$true] %s56_s11 }
   0xf   :  { %v45_v15 = vshrl.u32 %v44_v9, 7  ;;  %s93_s12 = scalar_lea.vmem %s57_s11, 32  ;;  %p98_p6 = scmp.lt.s32.totalorder %s57_s11, %s57_s11 }
  0x10   :  { %v24_v2 = vsub.f32 0.0, %v23_v1  ;;  %p94_p5 = scmp.ne.s32.totalorder %s57_s11, %s93_s12  ;;  %p99_p7 = scmp.lt.s32.totalorder %s93_s12, %s93_s12 }
  0x11   :  { %vm46_vm2 = vcmp.eq.s32.totalorder %v45_v15, 0 }
  0x12   :  { %v25_v3 = vmul.f32 1.442695, %v24_v2  ;;  %p100_p8 = por %p99_p7, %p98_p6 }
  0x14   :  { %67 = vpow2.f32 %v25_v3  ;;  %p101_p9 = pnand %p100_p8, %p94_p5 }
  0x21   :  { %v68_v4 = vpop.eup %67 }
  0x22   :  { %v27_v5 = vadd.f32 1.0, %v68_v4  ;;  %v30_v6 = vmul.f32 -0.5, %v68_v4  ;;  %v33_v8 = vand.u32 2147483647, %v68_v4 }
  0x24   :  { %69 = vlog2.f32 %v27_v5  ;;  %v31_v7 = vadd.f32 1.0, %v30_v6  ;;  %vm34_vm0 = vcmp.lt.f32.partialorder %v33_v8, 0.0004427343 }
  0x25   :  { %71 = vrcp.f32 %v27_v5 }
  0x26   :  { %v32_v10 = vmul.f32 %v68_v4, %v31_v7 }
  0x31   :  { %v70_v11 = vpop.eup %69 }
  0x32   :  { %v72_v13 = vpop.eup %71  ;;  %v29_v14 = vmul.f32 0.6931472, %v70_v11 }
  0x33   :  { %v41_v16 = vmul.f32 %v72_v13, %v68_v4 }
  0x34   :  { %v35_v17 = vsel %vm34_vm0, %v32_v10, %v29_v14 }
  0x35   :  { %v36_v18 = vadd.f32 %v35_v17, %v22_v12  ;;  %v42_v19 = vsel %vm40_vm1, %v72_v13, %v41_v16 }
  0x36   :  { %v43_v20 = vmul.f32 22.627417, %v42_v19 }
  0x37   :  { %v37_v21 = vadd.f32 1e-05, %v36_v18 }
  0x39   :  { %v47_v22 = vsel %vm46_vm2, %v37_v21, %v43_v20 }
  0x3a   :  { %49 = vst.msk [vmem:[#allocation5] sm:$0x3] %vm48_vm3, %v47_v22 }
  0x3b   :  { %104 = shalt.err (!%p101_p9)
}
  0x3c   :  { %59 = dma.vmem_to_hbm [thread:$0]  %s57_s11, 32, %s136_s1, [#allocation4]  }
  0x3d   :  { %115 = dma.done.wait [#allocation4], 32  }
  0x3e   :  { %116 = vsyncadd [#allocation4], 4294967264 }
  0x3f   :  { %63 = vsyncpa [#allocation3], 1 }
  0x40   :  { %64 = vsyncpa [#allocation4], 1 }

</bundles_post_ra>
